<compile_context>
chip_gen: v7x
topology: tpu7x:2x2x1
jax: 0.10.0
libtpu: 0.0.40
codegen_flags: <defaults>
</compile_context>

<pallas_src>
import jax
import jax.numpy as jnp
from jax.experimental import pallas as pl
from jax.experimental.pallas import tpu as pltpu


# Per-grid-step HBM byte target (x + y). 4 MiB is >= ~2.5us of DMA even on
# v7x's ~1.6 TB/s per-TC HBM, comfortably hiding the ~0.35us step overhead,
# and only ~5us on v5e. Double-buffered footprint stays under v5e's 16 MiB
# default scoped VMEM even before we raise vmem_limit_bytes explicitly.
_TARGET_STEP_BYTES = 4 << 20
_VMEM_TILE_BUDGET = 12 << 20     # double-buffered x+y tile budget
_MIN_TOTAL_STEPS = 4             # >=2 so both v7x TCs get work; 4 for balance


def _round_up(a, m):
    return (a + m - 1) // m * m


def _round_down(a, m):
    return (a // m) * m


# ---------------------------------------------------------------------------
# Kernel bodies
# ---------------------------------------------------------------------------

def _make_kernel_4d_vpu(cin, cout):
    """Dense (ts,128) spatial tiles, scalar weights/bias from SMEM, VPU FMAs."""

    def kernel(w_ref, b_ref, x_ref, o_ref):
        # w_ref: SMEM (cout*cin,) f32    b_ref: SMEM (cout,) f32
        # x_ref: VMEM (1, cin, ts, 128)  o_ref: VMEM (1, cout, ts, 128)
        tile = o_ref.shape[2:]                       # (ts, 128)
        for co in range(cout):                       # unrolled, cout is small
            acc = jnp.full(tile, b_ref[co], dtype=jnp.float32)
            for ci in range(cin):                    # unrolled, cin is small
                acc = acc + w_ref[co * cin + ci] * x_ref[0, ci].astype(jnp.float32)
            o_ref[0, co] = acc.astype(o_ref.dtype)

    return kernel


def _make_kernel_3d_vpu(cin, cout):
    """Fallback (H*W % 128 != 0): lane-dense (C, thw) tiles, SMEM scalars."""

    def kernel(w_ref, b_ref, x_ref, o_ref):
        # x_ref: VMEM (1, cin, thw)   o_ref: VMEM (1, cout, thw)
        x = x_ref[0].astype(jnp.float32)             # (cin, thw)
        thw = x.shape[1]
        for co in range(cout):
            acc = jnp.full((1, thw), b_ref[co], dtype=jnp.float32)
            for ci in range(cin):
                acc = acc + w_ref[co * cin + ci] * x[ci:ci + 1, :]
            o_ref[0, co:co + 1, :] = acc.astype(o_ref.dtype)

    return kernel


def _kernel_3d_mxu(w_ref, b_ref, x_ref, o_ref):
    """Large-channel path (Cin>=16 and Cout>=16): one MXU contraction."""
    x = x_ref[0].astype(jnp.float32)                 # (cin, thw)
    w = w_ref[...].astype(jnp.float32)               # (cout, cin)
    b = b_ref[...].astype(jnp.float32)               # (cout, 1)
    acc = jnp.dot(w, x, preferred_element_type=jnp.float32) + b
    o_ref[0] = acc.astype(o_ref.dtype)


# ---------------------------------------------------------------------------
# Wrapper
# ---------------------------------------------------------------------------

def outconv_pallas(x_nchw, weight, bias):
    """1x1 Conv2d forward (PyTorch OutConv).

    x_nchw : (N, Cin, H, W)
    weight : (Cout, Cin, 1, 1)  -- PyTorch nn.Conv2d weight layout
    bias   : (Cout,)
    returns (N, Cout, H, W) in x's dtype.
    """
    N, Cin, H, W = x_nchw.shape
    Cout = weight.shape[0]
    HW = H * W
    x_isz = jnp.dtype(x_nchw.dtype).itemsize
    sub = 8 * max(1, 4 // x_isz)                     # sublane quantum (8 f32 / 16 bf16)

    use_mxu = (Cin >= 16 and Cout >= 16)
    use_4d = (not use_mxu) and (HW % 128 == 0) and (HW >= 128)

    cost = pl.CostEstimate(
        flops=2 * N * HW * Cin * Cout,
        transcendentals=0,
        bytes_accessed=(N * Cin * HW * x_isz                       # x read
                        + N * Cout * HW * x_isz                    # y write
                        + Cout * Cin * jnp.dtype(weight.dtype).itemsize
                        + Cout * jnp.dtype(bias.dtype).itemsize),
    )

    if use_4d:
        # ---- dense (ts, 128) spatial layout; VPU path with SMEM scalars ----
        HW128 = HW // 128
        x4 = x_nchw.reshape(N, Cin, HW128, 128)      # free contiguous reshape
        w_flat = weight.reshape(Cout * Cin).astype(jnp.float32)
        b_flat = bias.reshape(Cout).astype(jnp.float32)

        # Bytes per ts-row of one grid step (x + y); no channel padding here.
        per_row = (Cin + Cout) * 128 * x_isz
        ts = max(8, _TARGET_STEP_BYTES // per_row)                    # DMA floor
        ts = min(ts, max(8, _VMEM_TILE_BUDGET // (2 * per_row)))      # VMEM cap
        ts = min(ts, HW128)
        if ts < HW128:
            ts = max(8, _round_down(ts, 8))          # (8,128) block-shape rule

        # Ensure enough total grid steps so both v7x TensorCores get work.
        n_ts = pl.cdiv(HW128, ts)
        if N * n_ts < _MIN_TOTAL_STEPS and HW128 >= 16:
            want = pl.cdiv(_MIN_TOTAL_STEPS, N)
            ts_alt = max(8, _round_down(HW128 // want, 8))
            if ts_alt < ts:
                ts = ts_alt
                n_ts = pl.cdiv(HW128, ts)

        tile_bytes = (Cin + Cout) * _round_up(ts, sub) * 128 * x_isz
        vmem_limit = int(min(max(2 * tile_bytes * 1.25 + (2 << 20), 8 << 20),
                             48 << 20))

        y4 = pl.pallas_call(
            _make_kernel_4d_vpu(Cin, Cout),
            out_shape=jax.ShapeDtypeStruct((N, Cout, HW128, 128), x_nchw.dtype),
            grid_spec=pltpu.PrefetchScalarGridSpec(
                num_scalar_prefetch=0,
                grid=(N, n_ts),
                in_specs=[
                    pl.BlockSpec(memory_space=pltpu.MemorySpace.SMEM),  # W flat
                    pl.BlockSpec(memory_space=pltpu.MemorySpace.SMEM),  # bias
                    pl.BlockSpec((1, Cin, ts, 128), lambda n, j: (n, 0, j, 0)),
                ],
                out_specs=pl.BlockSpec((1, Cout, ts, 128),
                                       lambda n, j: (n, 0, j, 0)),
            ),
            compiler_params=pltpu.CompilerParams(
                dimension_semantics=("parallel", "parallel"),
                vmem_limit_bytes=vmem_limit),
            cost_estimate=cost,
        )(w_flat, b_flat, x4)
        return y4.reshape(N, Cout, H, W)

    # ---- fallback: lane-dense (C, thw) layout (and the MXU path) ----
    x3 = x_nchw.reshape(N, Cin, HW)
    cin_pad = _round_up(Cin, sub)
    cout_pad = _round_up(Cout, sub)

    per_col_hbm = (Cin + Cout) * x_isz               # bytes moved per lane col
    per_col_vmem = (cin_pad + cout_pad) * x_isz      # VMEM (sublane-padded)

    thw = max(128, _TARGET_STEP_BYTES // per_col_hbm)
    thw = min(thw, max(128, _VMEM_TILE_BUDGET // (2 * per_col_vmem)))
    thw = min(thw, HW)
    if thw < HW:
        thw = max(128, _round_down(thw, 128))

    n_hw = pl.cdiv(HW, thw)
    if N * n_hw < _MIN_TOTAL_STEPS and HW >= 256:
        want = pl.cdiv(_MIN_TOTAL_STEPS, N)
        thw_alt = max(128, _round_down(HW // want, 128))
        if thw_alt < thw:
            thw = thw_alt
            n_hw = pl.cdiv(HW, thw)

    tile_bytes = (cin_pad + cout_pad) * _round_up(thw, 128) * x_isz
    extra = 0
    if use_mxu:
        w_isz = jnp.dtype(weight.dtype).itemsize
        extra = 2 * (_round_up(Cout, sub) * _round_up(Cin, 128) * w_isz
                     + _round_up(Cout, sub) * 128 * w_isz)
    vmem_limit = int(min(max(2 * tile_bytes * 1.25 + extra + (2 << 20), 8 << 20),
                         48 << 20))

    if use_mxu:
        w2 = weight.reshape(Cout, Cin)
        b2 = bias.reshape(Cout, 1)
        in_specs = [
            pl.BlockSpec((Cout, Cin), lambda n, j: (0, 0)),
            pl.BlockSpec((Cout, 1), lambda n, j: (0, 0)),
            pl.BlockSpec((1, Cin, thw), lambda n, j: (n, 0, j)),
        ]
        kernel = _kernel_3d_mxu
        args = (w2, b2, x3)
    else:
        w_flat = weight.reshape(Cout * Cin).astype(jnp.float32)
        b_flat = bias.reshape(Cout).astype(jnp.float32)
        in_specs = [
            pl.BlockSpec(memory_space=pltpu.MemorySpace.SMEM),
            pl.BlockSpec(memory_space=pltpu.MemorySpace.SMEM),
            pl.BlockSpec((1, Cin, thw), lambda n, j: (n, 0, j)),
        ]
        kernel = _make_kernel_3d_vpu(Cin, Cout)
        args = (w_flat, b_flat, x3)

    y3 = pl.pallas_call(
        kernel,
        out_shape=jax.ShapeDtypeStruct((N, Cout, HW), x_nchw.dtype),
        grid_spec=pltpu.PrefetchScalarGridSpec(
            num_scalar_prefetch=0,
            grid=(N, n_hw),
            in_specs=in_specs,
            out_specs=pl.BlockSpec((1, Cout, thw), lambda n, j: (n, 0, j)),
        ),
        compiler_params=pltpu.CompilerParams(
            dimension_semantics=("parallel", "parallel"),
            vmem_limit_bytes=vmem_limit),
        cost_estimate=cost,
    )(*args)
    return y3.reshape(N, Cout, H, W)


if __name__ == "__main__":
    # Small shapes consistent with the module: batch=2, in_channels=4,
    # out_channels=3, spatial=16x16.
    N, Cin, Cout, Hs, Ws = 2, 4, 3, 16, 16

    key = jax.random.PRNGKey(0)
    kx, kw, kb = jax.random.split(key, 3)

    x = jax.random.normal(kx, (N, Cin, Hs, Ws), dtype=jnp.float32)
    weight = jax.random.normal(kw, (Cout, Cin, 1, 1), dtype=jnp.float32) * 0.1
    bias = jax.random.normal(kb, (Cout,), dtype=jnp.float32) * 0.1

    y = jax.block_until_ready(outconv_pallas(x, weight, bias))

    # Reference check in plain JAX (einsum == 1x1 conv + bias).
    y_ref = jnp.einsum("nchw,oc->nohw", x, weight.reshape(Cout, Cin)) \
        + bias[None, :, None, None]
    assert y.shape == (N, Cout, Hs, Ws)
    assert jnp.allclose(y, y_ref, atol=1e-5, rtol=1e-5), \
        float(jnp.max(jnp.abs(y - y_ref)))

    print("KERNEL_OK")
</pallas_src>

<mosaic_0001>
module attributes {stable_mosaic.version = 11 : i64} {
  func.func @kernel(%arg0: i32, %arg1: i32, %arg2: memref<12xf32, #tpu.memory_space<smem>>, %arg3: memref<3xf32, #tpu.memory_space<smem>>, %arg4: memref<1x4x2x128xf32, #tpu.memory_space<vmem>>, %arg5: memref<1x3x2x128xf32, #tpu.memory_space<vmem>>) attributes {dimension_semantics = [#tpu.dimension_semantics<parallel>, #tpu.dimension_semantics<parallel>], iteration_bounds = array<i64: 2, 1>, scalar_prefetch = 0 : i64, scratch_operands = 0 : i64, tpu.core_type = #tpu.core_type<tc>, window_params = [{transform_indices = @transform_0, window_bounds = array<i64: 12>}, {transform_indices = @transform_1, window_bounds = array<i64: 3>}, {transform_indices = @transform_2, window_bounds = array<i64: 1, 4, 2, 128>}, {transform_indices = @transform_3, window_bounds = array<i64: 1, 3, 2, 128>}]} {
    %c0 = arith.constant 0 : index
    %0 = memref.load %arg3[%c0] : memref<3xf32, #tpu.memory_space<smem>>
    %1 = vector.broadcast %0 : f32 to vector<2x128xf32>
    %c0_0 = arith.constant 0 : index
    %2 = memref.load %arg2[%c0_0] : memref<12xf32, #tpu.memory_space<smem>>
    %c0_1 = arith.constant 0 : index
    %c0_2 = arith.constant 0 : index
    %c0_3 = arith.constant 0 : index
    %c0_4 = arith.constant 0 : index
    %3 = vector.load %arg4[%c0_1, %c0_2, %c0_3, %c0_4] : memref<1x4x2x128xf32, #tpu.memory_space<vmem>>, vector<1x1x2x128xf32>
    %4 = vector.shape_cast %3 : vector<1x1x2x128xf32> to vector<2x128xf32>
    %5 = vector.broadcast %2 : f32 to vector<2x128xf32>
    %6 = arith.mulf %5, %4 : vector<2x128xf32>
    %7 = arith.addf %1, %6 : vector<2x128xf32>
    %c1 = arith.constant 1 : index
    %8 = memref.load %arg2[%c1] : memref<12xf32, #tpu.memory_space<smem>>
    %c0_5 = arith.constant 0 : index
    %c1_6 = arith.constant 1 : index
    %c0_7 = arith.constant 0 : index
    %c0_8 = arith.constant 0 : index
    %9 = vector.load %arg4[%c0_5, %c1_6, %c0_7, %c0_8] : memref<1x4x2x128xf32, #tpu.memory_space<vmem>>, vector<1x1x2x128xf32>
    %10 = vector.shape_cast %9 : vector<1x1x2x128xf32> to vector<2x128xf32>
    %11 = vector.broadcast %8 : f32 to vector<2x128xf32>
    %12 = arith.mulf %11, %10 : vector<2x128xf32>
    %13 = arith.addf %7, %12 : vector<2x128xf32>
    %c2 = arith.constant 2 : index
    %14 = memref.load %arg2[%c2] : memref<12xf32, #tpu.memory_space<smem>>
    %c0_9 = arith.constant 0 : index
    %c2_10 = arith.constant 2 : index
    %c0_11 = arith.constant 0 : index
    %c0_12 = arith.constant 0 : index
    %15 = vector.load %arg4[%c0_9, %c2_10, %c0_11, %c0_12] : memref<1x4x2x128xf32, #tpu.memory_space<vmem>>, vector<1x1x2x128xf32>
    %16 = vector.shape_cast %15 : vector<1x1x2x128xf32> to vector<2x128xf32>
    %17 = vector.broadcast %14 : f32 to vector<2x128xf32>
    %18 = arith.mulf %17, %16 : vector<2x128xf32>
    %19 = arith.addf %13, %18 : vector<2x128xf32>
    %c3 = arith.constant 3 : index
    %20 = memref.load %arg2[%c3] : memref<12xf32, #tpu.memory_space<smem>>
    %c0_13 = arith.constant 0 : index
    %c3_14 = arith.constant 3 : index
    %c0_15 = arith.constant 0 : index
    %c0_16 = arith.constant 0 : index
    %21 = vector.load %arg4[%c0_13, %c3_14, %c0_15, %c0_16] : memref<1x4x2x128xf32, #tpu.memory_space<vmem>>, vector<1x1x2x128xf32>
    %22 = vector.shape_cast %21 : vector<1x1x2x128xf32> to vector<2x128xf32>
    %23 = vector.broadcast %20 : f32 to vector<2x128xf32>
    %24 = arith.mulf %23, %22 : vector<2x128xf32>
    %25 = arith.addf %19, %24 : vector<2x128xf32>
    %c0_17 = arith.constant 0 : index
    %c0_18 = arith.constant 0 : index
    %c0_19 = arith.constant 0 : index
    %c0_20 = arith.constant 0 : index
    %26 = vector.load %arg5[%c0_17, %c0_18, %c0_19, %c0_20] : memref<1x3x2x128xf32, #tpu.memory_space<vmem>>, vector<1x1x2x128xf32>
    %27 = vector.shape_cast %26 : vector<1x1x2x128xf32> to vector<2x128xf32>
    %28 = vector.shape_cast %25 : vector<2x128xf32> to vector<1x1x2x128xf32>
    tpu.vector_store %arg5[%c0_17, %c0_18, %c0_19, %c0_20], %28 {strides = array<i32>} : memref<1x3x2x128xf32, #tpu.memory_space<vmem>>, vector<1x1x2x128xf32>,
    %c1_21 = arith.constant 1 : index
    %29 = memref.load %arg3[%c1_21] : memref<3xf32, #tpu.memory_space<smem>>
    %30 = vector.broadcast %29 : f32 to vector<2x128xf32>
    %c4 = arith.constant 4 : index
    %31 = memref.load %arg2[%c4] : memref<12xf32, #tpu.memory_space<smem>>
    %c0_22 = arith.constant 0 : index
    %c0_23 = arith.constant 0 : index
    %c0_24 = arith.constant 0 : index
    %c0_25 = arith.constant 0 : index
    %32 = vector.load %arg4[%c0_22, %c0_23, %c0_24, %c0_25] : memref<1x4x2x128xf32, #tpu.memory_space<vmem>>, vector<1x1x2x128xf32>
    %33 = vector.shape_cast %32 : vector<1x1x2x128xf32> to vector<2x128xf32>
    %34 = vector.broadcast %31 : f32 to vector<2x128xf32>
    %35 = arith.mulf %34, %33 : vector<2x128xf32>
    %36 = arith.addf %30, %35 : vector<2x128xf32>
    %c5 = arith.constant 5 : index
    %37 = memref.load %arg2[%c5] : memref<12xf32, #tpu.memory_space<smem>>
    %c0_26 = arith.constant 0 : index
    %c1_27 = arith.constant 1 : index
    %c0_28 = arith.constant 0 : index
    %c0_29 = arith.constant 0 : index
    %38 = vector.load %arg4[%c0_26, %c1_27, %c0_28, %c0_29] : memref<1x4x2x128xf32, #tpu.memory_space<vmem>>, vector<1x1x2x128xf32>
    %39 = vector.shape_cast %38 : vector<1x1x2x128xf32> to vector<2x128xf32>
    %40 = vector.broadcast %37 : f32 to vector<2x128xf32>
    %41 = arith.mulf %40, %39 : vector<2x128xf32>
    %42 = arith.addf %36, %41 : vector<2x128xf32>
    %c6 = arith.constant 6 : index
    %43 = memref.load %arg2[%c6] : memref<12xf32, #tpu.memory_space<smem>>
    %c0_30 = arith.constant 0 : index
    %c2_31 = arith.constant 2 : index
    %c0_32 = arith.constant 0 : index
    %c0_33 = arith.constant 0 : index
    %44 = vector.load %arg4[%c0_30, %c2_31, %c0_32, %c0_33] : memref<1x4x2x128xf32, #tpu.memory_space<vmem>>, vector<1x1x2x128xf32>
    %45 = vector.shape_cast %44 : vector<1x1x2x128xf32> to vector<2x128xf32>
    %46 = vector.broadcast %43 : f32 to vector<2x128xf32>
    %47 = arith.mulf %46, %45 : vector<2x128xf32>
    %48 = arith.addf %42, %47 : vector<2x128xf32>
    %c7 = arith.constant 7 : index
    %49 = memref.load %arg2[%c7] : memref<12xf32, #tpu.memory_space<smem>>
    %c0_34 = arith.constant 0 : index
    %c3_35 = arith.constant 3 : index
    %c0_36 = arith.constant 0 : index
    %c0_37 = arith.constant 0 : index
    %50 = vector.load %arg4[%c0_34, %c3_35, %c0_36, %c0_37] : memref<1x4x2x128xf32, #tpu.memory_space<vmem>>, vector<1x1x2x128xf32>
    %51 = vector.shape_cast %50 : vector<1x1x2x128xf32> to vector<2x128xf32>
    %52 = vector.broadcast %49 : f32 to vector<2x128xf32>
    %53 = arith.mulf %52, %51 : vector<2x128xf32>
    %54 = arith.addf %48, %53 : vector<2x128xf32>
    %c0_38 = arith.constant 0 : index
    %c1_39 = arith.constant 1 : index
    %c0_40 = arith.constant 0 : index
    %c0_41 = arith.constant 0 : index
    %55 = vector.load %arg5[%c0_38, %c1_39, %c0_40, %c0_41] : memref<1x3x2x128xf32, #tpu.memory_space<vmem>>, vector<1x1x2x128xf32>
    %56 = vector.shape_cast %55 : vector<1x1x2x128xf32> to vector<2x128xf32>
    %57 = vector.shape_cast %54 : vector<2x128xf32> to vector<1x1x2x128xf32>
    tpu.vector_store %arg5[%c0_38, %c1_39, %c0_40, %c0_41], %57 {strides = array<i32>} : memref<1x3x2x128xf32, #tpu.memory_space<vmem>>, vector<1x1x2x128xf32>,
    %c2_42 = arith.constant 2 : index
    %58 = memref.load %arg3[%c2_42] : memref<3xf32, #tpu.memory_space<smem>>
    %59 = vector.broadcast %58 : f32 to vector<2x128xf32>
    %c8 = arith.constant 8 : index
    %60 = memref.load %arg2[%c8] : memref<12xf32, #tpu.memory_space<smem>>
    %c0_43 = arith.constant 0 : index
    %c0_44 = arith.constant 0 : index
    %c0_45 = arith.constant 0 : index
    %c0_46 = arith.constant 0 : index
    %61 = vector.load %arg4[%c0_43, %c0_44, %c0_45, %c0_46] : memref<1x4x2x128xf32, #tpu.memory_space<vmem>>, vector<1x1x2x128xf32>
    %62 = vector.shape_cast %61 : vector<1x1x2x128xf32> to vector<2x128xf32>
    %63 = vector.broadcast %60 : f32 to vector<2x128xf32>
    %64 = arith.mulf %63, %62 : vector<2x128xf32>
    %65 = arith.addf %59, %64 : vector<2x128xf32>
    %c9 = arith.constant 9 : index
    %66 = memref.load %arg2[%c9] : memref<12xf32, #tpu.memory_space<smem>>
    %c0_47 = arith.constant 0 : index
    %c1_48 = arith.constant 1 : index
    %c0_49 = arith.constant 0 : index
    %c0_50 = arith.constant 0 : index
    %67 = vector.load %arg4[%c0_47, %c1_48, %c0_49, %c0_50] : memref<1x4x2x128xf32, #tpu.memory_space<vmem>>, vector<1x1x2x128xf32>
    %68 = vector.shape_cast %67 : vector<1x1x2x128xf32> to vector<2x128xf32>
    %69 = vector.broadcast %66 : f32 to vector<2x128xf32>
    %70 = arith.mulf %69, %68 : vector<2x128xf32>
    %71 = arith.addf %65, %70 : vector<2x128xf32>
    %c10 = arith.constant 10 : index
    %72 = memref.load %arg2[%c10] : memref<12xf32, #tpu.memory_space<smem>>
    %c0_51 = arith.constant 0 : index
    %c2_52 = arith.constant 2 : index
    %c0_53 = arith.constant 0 : index
    %c0_54 = arith.constant 0 : index
    %73 = vector.load %arg4[%c0_51, %c2_52, %c0_53, %c0_54] : memref<1x4x2x128xf32, #tpu.memory_space<vmem>>, vector<1x1x2x128xf32>
    %74 = vector.shape_cast %73 : vector<1x1x2x128xf32> to vector<2x128xf32>
    %75 = vector.broadcast %72 : f32 to vector<2x128xf32>
    %76 = arith.mulf %75, %74 : vector<2x128xf32>
    %77 = arith.addf %71, %76 : vector<2x128xf32>
    %c11 = arith.constant 11 : index
    %78 = memref.load %arg2[%c11] : memref<12xf32, #tpu.memory_space<smem>>
    %c0_55 = arith.constant 0 : index
    %c3_56 = arith.constant 3 : index
    %c0_57 = arith.constant 0 : index
    %c0_58 = arith.constant 0 : index
    %79 = vector.load %arg4[%c0_55, %c3_56, %c0_57, %c0_58] : memref<1x4x2x128xf32, #tpu.memory_space<vmem>>, vector<1x1x2x128xf32>
    %80 = vector.shape_cast %79 : vector<1x1x2x128xf32> to vector<2x128xf32>
    %81 = vector.broadcast %78 : f32 to vector<2x128xf32>
    %82 = arith.mulf %81, %80 : vector<2x128xf32>
    %83 = arith.addf %77, %82 : vector<2x128xf32>
    %c0_59 = arith.constant 0 : index
    %c2_60 = arith.constant 2 : index
    %c0_61 = arith.constant 0 : index
    %c0_62 = arith.constant 0 : index
    %84 = vector.load %arg5[%c0_59, %c2_60, %c0_61, %c0_62] : memref<1x3x2x128xf32, #tpu.memory_space<vmem>>, vector<1x1x2x128xf32>
    %85 = vector.shape_cast %84 : vector<1x1x2x128xf32> to vector<2x128xf32>
    %86 = vector.shape_cast %83 : vector<2x128xf32> to vector<1x1x2x128xf32>
    tpu.vector_store %arg5[%c0_59, %c2_60, %c0_61, %c0_62], %86 {strides = array<i32>} : memref<1x3x2x128xf32, #tpu.memory_space<vmem>>, vector<1x1x2x128xf32>,
    return
  }
  func.func @transform_0(%arg0: i32, %arg1: i32) -> i32 {
    %c0_i32 = arith.constant 0 : i32
    %c0_i32_0 = arith.constant 0 : i32
    return %c0_i32 : i32
  }
  func.func @transform_1(%arg0: i32, %arg1: i32) -> i32 {
    %c0_i32 = arith.constant 0 : i32
    %c0_i32_0 = arith.constant 0 : i32
    return %c0_i32 : i32
  }
  func.func @transform_2(%arg0: i32, %arg1: i32) -> (i32, i32, i32, i32) {
    %c0_i32 = arith.constant 0 : i32
    %c0_i32_0 = arith.constant 0 : i32
    %c0_i32_1 = arith.constant 0 : i32
    return %arg0, %c0_i32, %arg1, %c0_i32_0 : i32, i32, i32, i32
  }
  func.func @transform_3(%arg0: i32, %arg1: i32) -> (i32, i32, i32, i32) {
    %c0_i32 = arith.constant 0 : i32
    %c0_i32_0 = arith.constant 0 : i32
    %c0_i32_1 = arith.constant 0 : i32
    return %arg0, %c0_i32, %arg1, %c0_i32_0 : i32, i32, i32, i32
  }
}

</mosaic_0001>

<bundles_post_ra>
// kernel: tpu_custom_call.1
= control target key start
LH: loop header
LB: loop body
LE: loop exit
PB: predicated region body
PF: predicated region fallthrough
CT: control target
= control target key end

     0   :  { %8 = vsyncpa [#allocation5], 0  ;;  %s1000_s0 = inlined_call_operand.hbm [shape: f32[12], index: 0, kind: input, shape index: {}]   ;;  %s1001_s1 = inlined_call_operand.vmem [shape: f32[3], index: 1, kind: input, shape index: {}]   ;;  %s1002_s2 = inlined_call_operand.hbm [shape: f32[2,4,2,128], index: 2, kind: input, shape index: {}]   ;;  %s1003_s3 = inlined_call_operand.hbm [shape: f32[2,3,2,128], index: 3, kind: output, shape index: {}]  }
   0x1   :  { %9 = vsyncpa [#allocation6], 0 }
   0x2   :  { %10 = vsyncpa [#allocation3], 0 }
   0x3   :  { %12 = vsyncpa [#allocation3 + $0x1], 0 }
   0x4   :  { %13 = vsyncpa [#allocation4], 0 }
   0x5   :  { %15 = vsyncpa [#allocation4 + $0x1], 0  ;;  %s737_s12 = smov 0   ;;  %s739_s13 = smov 0  }
   0x6   :  { %s741_s14 = smov 0   ;;  %s743_s15 = smov 0  }
   0x7   :  { %s745_s16 = smov 0   ;;  %s747_s17 = smov 0  }
   0x8 LB: > { %s429_s18 = sadd.s32 4294967295, %s707_s17   ;;  %s430_s19 = sadd.s32 4294967294, %s707_s17   ;;  %s707_s17 = sphi %s747_s17, %s21_s17   ;;  %s703_s16 = sphi %s745_s16, %s1024_s16   ;;  %s699_s15 = sphi %s743_s15, %s1023_s15   ;;  %s695_s14 = sphi %s741_s14, %s1022_s14   ;;  %s691_s13 = sphi %s739_s13, %s1021_s13   ;;  %s687_s12 = sphi %s737_s12, %s1020_s12  }
   0x9   : > { %s84_s20 = sadd.s32 1, %s695_s14  ;;  %p91_p0 = scmp.ne.s32.totalorder %s695_s14, %s691_s13 }
   0xa   : > { %p92_p1 = scmp.eq.s32.totalorder %s707_s17, 0  ;;  %p97_p2 = scmp.ne.s32.totalorder %s691_s13, %s687_s12 }
   0xb   : > { %p775_p3 = scmp.eq.s32.totalorder %s429_s18, 0  ;;  %p123_p4 = scmp.eq.s32.totalorder %s429_s18, 1 }
   0xc   : > { %p93_p5 = por %p92_p1, %p91_p0  ;;  %p129_p6 = scmp.eq.s32.totalorder %s430_s19, 1 }
   0xd   : > { %s1008_s21 = scalar_select %p775_p3, 1, 0 }
   0xe   : > { %p781_p7 = por %p775_p3, %p97_p2  ;;  %p785_p8 = por %p123_p4, %p91_p0 }
   0xf   : > { %p789_p9 = por %p129_p6, %p97_p2  ;;  %p431_p10 = scmp.ge.s32.totalorder %s707_s17, 1 }
  0x10   : > { %s1009_s22 = scalar_select %p781_p7, 1, 0 }
  0x11   : > { %s1010_s23 = scalar_select %p785_p8, 1, 0 }
  0x12   : > { %s1011_s24 = scalar_select %p789_p9, 1, 0 }
  0x13   : > { %p136_p11 = scmp.lt.s32.totalorder %s707_s17, 3  ;;  %p501_p1 = scmp.lt.s32.totalorder %s707_s17, 2 }
  0x14   : > { %s158_s28 = sshll.u32 %s1001_s1, 4  ;;  %s169_s4 = sand.u32 1, %s695_s14   ;;  %s159_s28 = int_to_ptr.vmem [resolvable:$true] %s158_s28 }
  0x15   : > { %p796_p13 = pnand %p431_p10, %p136_p11  ;;  %p806_p4 = pnand %p501_p1, %p93_p5 }
  0x16   : > { %s33_s5 = sadd.s32 1, %s703_s16  ;;  %s559_s8 = scalar_lea.hbm %s1000_s0, 16 }
  0x17   : > { %p484_p0 = pneg %p796_p13  ;;  %p560_p5 = scmp.ne.s32.totalorder %s1000_s0, %s559_s8 }
  0x18   : > { %p566_p1 = scmp.lt.u32.totalorder %s559_s8, %s1000_s0 }
  0x19   : > { %p812_p2 = pnand %p484_p0, %p775_p3 }
  0x1b   : > { %p561_p6 = pneg %p812_p2 }
  0x1d   : > { %p562_p10 = pnand %p561_p6, %p560_p5 }
  0x1f   : > { %p563_p11 = pneg %p562_p10 }
  0x21   : > { %p568_p0 = pnand %p566_p1, %p563_p11 }
  0x23   : > { %571 = shalt.err (!%p568_p0)
}
  0x24   : > { %s709_s19 = smov [#allocation2]   ;;  %s572_s6 = scalar_lea.vmem %s159_s28, 16 }
  0x25   : > { %487 = dma.hbm_to_smem (!%p812_p2), %s1000_s0, 16, %s709_s19, [#allocation5]  }
  0x26   : > { %p573_p12 = scmp.ne.s32.totalorder %s159_s28, %s572_s6  ;;  %p580_p7 = scmp.lt.s32.totalorder %s159_s28, %s159_s28 }
  0x27   : > { %p581_p5 = scmp.lt.s32.totalorder %s572_s6, %s572_s6 }
  0x28   : > { %p575_p9 = pnand %p573_p12, %p561_p6 }
  0x29   : > { %p582_p10 = por %p581_p5, %p580_p7 }
  0x2a   : > { %p576_p8 = pneg %p575_p9 }
  0x2c   : > { %p583_p3 = pnand %p582_p10, %p576_p8 }
  0x2e   : > { %586 = shalt.err (!%p583_p3)
}
  0x2f   : > { %s710_s7 = smov [#allocation7]   ;;  %p35_p11 = scmp.ge.s32.totalorder %s33_s5, 2 }
  0x30   : > { %490 = dma.vmem_to_smem (!%p812_p2), %s159_s28, 16, %s710_s7, [#allocation6]  }
  0x31   : > { %s435_s8 = sshll.u32 %s169_s4, 3  ;;  %s469_s9 = sshll.u32 %s703_s16, 7 }
  0x32   : > { %s1026_s5 = smov (%p35_p11, %s33_s5), 0  ;;  %s844_s30 = scalar_lea.hbm %s1002_s2, %s469_s9 }
  0x33   : > { %s79_s18 = ssub.s32 %s703_s16, %s1026_s5  ;;  %s173_s19 = scalar_lea.vmem [#allocation8], %s435_s8 }
  0x34   : > { %s181_s28 = sshll.u32 %s173_s19, 4  ;;  %p82_p3 = scmp.eq.s32.totalorder %s79_s18, 0  ;;  %s848_s28 = int_to_ptr.vmem [resolvable:$true] %s181_s28 }
  0x35   : > { %s857_s27 = scalar_lea.sflag [#allocation3], %s169_s4  ;;  %s587_s6 = scalar_lea.hbm %s844_s30, 128 }
  0x36   : > { %s853_s26 = scalar_select %p82_p3, %s695_s14, %s84_s20  }
  0x37   : > { %p588_p7 = scmp.ne.s32.totalorder %s844_s30, %s587_s6  ;;  %p589_p8 = pneg %p806_p4 }
  0x38   : > { %s592_s9 = scalar_lea.hbm %s1002_s2, 256  ;;  %p593_p2 = scmp.lt.u32.totalorder %s844_s30, %s1002_s2 }
  0x39   : > { %p590_p9 = pnand %p589_p8, %p588_p7  ;;  %p594_p6 = scmp.lt.u32.totalorder %s592_s9, %s587_s6 }
  0x3a   : > { %p596_p0 = scmp.lt.u32.totalorder %s587_s6, %s844_s30 }
  0x3b   : > { %p591_p12 = pneg %p590_p9  ;;  %p595_p1 = por %p594_p6, %p593_p2 }
  0x3d   : > { %p597_p5 = por %p596_p0, %p595_p1 }
  0x3f   : > { %p598_p10 = pnand %p597_p5, %p591_p12 }
  0x41   : > { %601 = shalt.err (!%p598_p10)
}
  0x42   : > { %s602_s20 = scalar_lea.vmem %s848_s28, 128  ;;  %s711_s4 = smov [#allocation8]  }
  0x43   : > { %p603_p11 = scmp.ne.s32.totalorder %s848_s28, %s602_s20  ;;  %s607_s18 = sshll.u32 %s711_s4, 4  ;;  %s608_s18 = int_to_ptr.vmem [resolvable:$false] %s607_s18 }
  0x44   : > { %s609_s19 = scalar_lea.vmem %s608_s18, 256  ;;  %p610_p9 = scmp.lt.s32.totalorder %s848_s28, %s608_s18 }
  0x45   : > { %p605_p3 = pnand %p603_p11, %p589_p8  ;;  %p611_p2 = scmp.lt.s32.totalorder %s609_s19, %s602_s20 }
  0x47   : > { %p606_p7 = pneg %p605_p3  ;;  %p612_p6 = por %p611_p2, %p610_p9 }
  0x49   : > { %p613_p1 = pnand %p612_p6, %p606_p7 }
  0x4b   : > { %616 = shalt.err (!%p613_p1)
}
  0x4c   : > { %s712_s6 = smov 32   ;;  %s713_s7 = smov 2  }
  0x4d   : > { %494 = dma.hbm_to_vmem [thread:$0]  (!%p806_p4), %s844_s30, 128, %s848_s28, %s857_s27, %s712_s6, %s712_s6, %s713_s7  }
  0x4e   : > { %193 = sbr.rel (%p796_p13) target bundleno = 131 (0x83), region = 32  ;;  %p1015_p8 = scmp.ne.s32.totalorder (!%p796_p13), %s1008_s21, 0 }
  0x55   : > { %670 = dma.done.wait (%p1015_p8), [#allocation5], 16  }
  0x56   : > { %672 = vsyncadd (%p1015_p8), [#allocation5], 4294967280 }
  0x57   : > { %674 = dma.done.wait (%p1015_p8), [#allocation6], 16  }
  0x58   : > { %676 = vsyncadd (%p1015_p8), [#allocation6], 4294967280  ;;  %s896_s8 = sand.u32 1, %s691_s13   ;;  %p1016_p13 = scmp.ne.s32.totalorder %s1009_s22, 0 }
  0x59   : > { %s441_s25 = sshll.u32 %s896_s8, 3  ;;  %s204_s29 = scalar_lea.sflag [#allocation3], %s896_s8 }
  0x5a   : > { %s900_s30 = scalar_lea.vmem [#allocation8], %s441_s25 }
  0x5b   : > { %678 = dma.done.wait (%p1016_p13), %s204_s29, 128  }
  0x5c   : > { %680 = vsyncadd (%p1016_p13), %s204_s29, 4294967168 }
  0x5d   : > { %212 = sfence }
  0x5e   : > { %s231_s28 = sld [smem:[#allocation7]]  ;;  %s442_s27 = sld [smem:[#allocation2 + $0x1]]  ;;  %v234_v0 = vld [vmem:[%s900_s30] sm:$0x3]  ;;  %v443_v1 = vld [vmem:[%s900_s30 + $0x2] sm:$0x3] }
  0x5f   : > { %s233_s21 = sld [smem:[#allocation2]]  ;;  %s444_s9 = sld [smem:[#allocation2 + $0x2]]  ;;  %v445_v5 = vld [vmem:[%s900_s30 + $0x4] sm:$0x3]  ;;  %v447_v9 = vld [vmem:[%s900_s30 + $0x6] sm:$0x3] }
  0x60   : > { %s446_s10 = sld [smem:[#allocation2 + $0x3]]  ;;  %s907_s11 = sld [smem:[#allocation7 + $0x1]]  ;;  %v260_v11 = vld [vmem:[%s900_s30] sm:$0x3]  ;;  %v451_v12 = vld [vmem:[%s900_s30 + $0x2] sm:$0x3] }
  0x61   : > { %s449_s20 = sld [smem:[#allocation2 + $0x4]]  ;;  %s450_s4 = sld [smem:[#allocation2 + $0x5]]  ;;  %v453_v15 = vld [vmem:[%s900_s30 + $0x4] sm:$0x3]  ;;  %v284_v20 = vld [vmem:[%s900_s30] sm:$0x3] }
  0x62   : > { %s910_s18 = sld [smem:[#allocation2 + $0x6]]  ;;  %s912_s22 = sld [smem:[#allocation2 + $0x7]]  ;;  %v455_v25 = vld [vmem:[%s900_s30 + $0x6] sm:$0x3]  ;;  %v460_v29 = vld [vmem:[%s900_s30 + $0x2] sm:$0x3] }
  0x63   : > { %s915_s19 = sld [smem:[#allocation7 + $0x2]]  ;;  %s917_s6 = sld [smem:[#allocation2 + $0x8]]  ;;  %v462_v34 = vld [vmem:[%s900_s30 + $0x4] sm:$0x3]  ;;  %v464_v38 = vld [vmem:[%s900_s30 + $0x6] sm:$0x3] }
  0x64   : > { %v232_v2 = vstv %s231_s28  ;;  %v241_v4 = vstv %s442_s27  ;;  %s920_s7 = sld [smem:[#allocation2 + $0x9]]  ;;  %s922_s25 = sld [smem:[#allocation2 + $0xa]] }
  0x65   : > { %v235_v3 = vstv %s233_s21  ;;  %v242_v7 = vmul.f32 %v443_v1, %v241_v4  ;;  %v247_v8 = vstv %s444_s9  ;;  %s926_s29 = sld [smem:[#allocation2 + $0xb]]  ;;  %s470_s28 = smul.u32 6, %s896_s8 }
  0x66   : > { %v236_v6 = vmul.f32 %v235_v3, %v234_v0  ;;  %v253_v10 = vstv %s446_s10  ;;  %v248_v14 = vmul.f32 %v445_v5, %v247_v8  ;;  %v258_v17 = vstv %s907_s11  ;;  %s471_s9 = smul.u32 96, %s699_s15  ;;  %p1017_p12 = scmp.ne.s32.totalorder %s1010_s23, 0 }
  0x67   : > { %v254_v16 = vmul.f32 %v447_v9, %v253_v10  ;;  %v261_v18 = vstv %s449_s20  ;;  %v266_v19 = vstv %s450_s4  ;;  %s230_s21 = scalar_lea.vmem [#allocation9], %s470_s28  ;;  %s306_s20 = scalar_lea.sflag [#allocation4], %s896_s8 }
  0x68   : > { %v237_v13 = vadd.f32 %v236_v6, %v232_v2  ;;  %v262_v22 = vmul.f32 %v261_v18, %v260_v11  ;;  %v267_v23 = vmul.f32 %v451_v12, %v266_v19  ;;  %v271_v24 = vstv %s910_s18  ;;  %s320_s27 = sshll.u32 %s230_s21, 4  ;;  %s951_s11 = scalar_lea.hbm %s1003_s3, %s471_s9  ;;  %s946_s27 = int_to_ptr.vmem [resolvable:$true] %s320_s27 }
  0x69   : > { %v276_v26 = vstv %s912_s22  ;;  %v282_v27 = vstv %s915_s19  ;;  %v285_v28 = vstv %s917_s6  ;;  %v272_v32 = vmul.f32 %v453_v15, %v271_v24  ;;  %s617_s4 = scalar_lea.vmem %s946_s27, 96  ;;  %s714_s15 = smov [#allocation9]  }
  0x6a   : > { %v243_v21 = vadd.f32 %v242_v7, %v237_v13  ;;  %v263_v31 = vadd.f32 %v262_v22, %v258_v17  ;;  %v286_v33 = vmul.f32 %v285_v28, %v284_v20  ;;  %v277_v35 = vmul.f32 %v455_v25, %v276_v26  ;;  %p618_p4 = scmp.ne.s32.totalorder %s946_s27, %s617_s4  ;;  %s621_s18 = sshll.u32 %s714_s15, 4  ;;  %s622_s18 = int_to_ptr.vmem [resolvable:$false] %s621_s18 }
  0x6b   : > { %v290_v36 = vstv %s920_s7  ;;  %v295_v37 = vstv %s922_s25  ;;  %v300_v39 = vstv %s926_s29  ;;  %s623_s22 = scalar_lea.vmem %s622_s18, 192  ;;  %p624_p10 = scmp.lt.s32.totalorder %s946_s27, %s622_s18 }
  0x6c   : > { %v249_v30 = vadd.f32 %v248_v14, %v243_v21  ;;  %v268_v41 = vadd.f32 %v267_v23, %v263_v31  ;;  %v287_v42 = vadd.f32 %v286_v33, %v282_v27  ;;  %v291_v43 = vmul.f32 %v460_v29, %v290_v36  ;;  %p619_p0 = pnand %p618_p4, %p1017_p12  ;;  %p625_p11 = scmp.lt.s32.totalorder %s623_s22, %s617_s4 }
  0x6d   : > { %v296_v44 = vmul.f32 %v462_v34, %v295_v37  ;;  %v301_v47 = vmul.f32 %v464_v38, %v300_v39 }
  0x6e   : > { %v255_v40 = vadd.f32 %v254_v16, %v249_v30  ;;  %v273_v45 = vadd.f32 %v272_v32, %v268_v41  ;;  %v292_v46 = vadd.f32 %v291_v43, %v287_v42  ;;  %p620_p5 = pneg %p619_p0  ;;  %p626_p3 = por %p625_p11, %p624_p10 }
  0x70   : > { %256 = vst [vmem:[%s230_s21] sm:$0x3] %v255_v40  ;;  %v278_v48 = vadd.f32 %v277_v35, %v273_v45  ;;  %v297_v49 = vadd.f32 %v296_v44, %v292_v46  ;;  %p627_p7 = pnand %p626_p3, %p620_p5 }
  0x72   : > { %456 = vst [vmem:[%s230_s21 + $0x2] sm:$0x3] %v278_v48  ;;  %v302_v50 = vadd.f32 %v301_v47, %v297_v49 }
  0x74   : > { %465 = vst [vmem:[%s230_s21 + $0x4] sm:$0x3] %v302_v50 }
  0x75   : > { %630 = shalt.err (!%p627_p7)
}
  0x76   : > { %s631_s19 = scalar_lea.hbm %s951_s11, 96  ;;  %s635_s25 = scalar_lea.hbm %s1003_s3, 192 }
  0x77   : > { %p632_p9 = scmp.ne.s32.totalorder %s951_s11, %s631_s19  ;;  %p636_p1 = scmp.lt.u32.totalorder %s951_s11, %s1003_s3 }
  0x78   : > { %p637_p8 = scmp.lt.u32.totalorder %s635_s25, %s631_s19  ;;  %p639_p4 = scmp.lt.u32.totalorder %s631_s19, %s951_s11 }
  0x79   : > { %p633_p2 = pnand %p632_p9, %p1017_p12 }
  0x7a   : > { %p638_p13 = por %p637_p8, %p636_p1 }
  0x7b   : > { %p634_p6 = pneg %p633_p2 }
  0x7c   : > { %p640_p0 = por %p639_p4, %p638_p13 }
  0x7e   : > { %p641_p5 = pnand %p640_p0, %p634_p6 }
  0x80   : > { %644 = shalt.err (!%p641_p5)
}
  0x81   : > { %s715_s21 = smov 32   ;;  %s716_s9 = smov 2  }
  0x82   : > { %482 = dma.vmem_to_hbm [thread:$0]  (%p1017_p12), %s946_s27, 96, %s951_s11, %s306_s20, %s715_s21, %s715_s21, %s716_s9  }
  0x83 PF: > { %s335_s30 = sand.u32 1, %s687_s12   ;;  %p1018_p10 = scmp.ne.s32.totalorder %s1011_s24, 0 }
  0x84   : > { %p1019_p11 = scmp.ge.s32.totalorder %s707_s17, 2  ;;  %s336_s10 = scalar_lea.sflag [#allocation4], %s335_s30 }
  0x86   : > { %p496_p3 = pnand %p1019_p11, %p1018_p10 }
  0x88   : > { %682 = dma.done.wait (!%p496_p3), %s336_s10, 96  }
  0x89   : > { %684 = vsyncadd (!%p496_p3), %s336_s10, 4294967200  ;;  %s21_s17 = sadd.s32 1, %s707_s17   ;;  %s1020_s12 = smov %s691_s13 }
  0x8a   : > { %p18_p7 = scmp.ge.s32.totalorder %s21_s17, 4   ;;  %s1021_s13 = smov %s695_s14 }
  0x8b   : > { %s1022_s14 = smov %s853_s26  ;;  %s1023_s15 = smov %s703_s16 }
  0x8c   : > { %s1024_s16 = smov %s1026_s5  ;;  %20 = sbr.rel (!%p18_p7) target bundleno = 8 (0x8), region = 92 }
  0x93   :  { %341 = vsyncpa [#allocation3], 1 }
  0x94   :  { %343 = vsyncpa [#allocation3 + $0x1], 1 }
  0x95   :  { %344 = vsyncpa [#allocation4], 1 }
  0x96   :  { %346 = vsyncpa [#allocation4 + $0x1], 1 }
  0x97   :  { %347 = vsyncpa [#allocation5], 1 }
  0x98   :  { %349 = vsyncpa [#allocation5 + $0x1], 1 }
  0x99   :  { %350 = vsyncpa [#allocation6], 1 }
  0x9a   :  { %352 = vsyncpa [#allocation6 + $0x1], 1 }

</bundles_post_ra>
